<compile_context>
chip_gen: v7x
topology: tpu7x:2x2x1
jax: 0.10.0
libtpu: 0.0.40
codegen_flags: <defaults>
</compile_context>

<pallas_src>
import functools

import jax
import jax.numpy as jnp
from jax.experimental import pallas as pl
from jax.experimental.pallas import tpu as pltpu

LANE = 128  # padded hidden / output lane width (one MXU tile wide)


# --------------------------------------------------------------------------- #
# Kernels
# --------------------------------------------------------------------------- #
def _mlp_q_f32(state_ref, p_ref):
    """Shared body: q = relu(relu(x@W1+b1)@W2+b2)@W3+b3, all 128-lane wide."""
    S = state_ref.shape[-1]            # state_dim
    HP = p_ref.shape[-1]               # padded hidden width (128)
    bo = S + 2 * HP                    # row offset of the (single) bias block

    x = state_ref[...]                                       # (TB, S) f32
    w1 = p_ref[0:S, :]                                        # (S,   128)
    w2 = p_ref[S:S + HP, :]                                   # (128, 128)
    w3 = p_ref[S + HP:S + 2 * HP, :]                          # (128, 128)
    b1 = p_ref[bo:bo + 1, :]                                  # (1, 128) -- all three
    b2 = p_ref[bo + 1:bo + 2, :]                              #            biases share
    b3 = p_ref[bo + 2:bo + 3, :]                              #            one 8x128 tile

    hp = jax.lax.Precision.HIGHEST     # guard f32 accuracy (1e-5 tolerance)
    h = jnp.maximum(
        jnp.dot(x, w1, precision=hp, preferred_element_type=jnp.float32) + b1, 0.0)
    h = jnp.maximum(
        jnp.dot(h, w2, precision=hp, preferred_element_type=jnp.float32) + b2, 0.0)
    return jnp.dot(h, w3, precision=hp, preferred_element_type=jnp.float32) + b3


def dqn_q_kernel(state_ref, p_ref, q_ref):
    """Writes the lane-dense (TB, 128) q-value slab."""
    q_ref[...] = _mlp_q_f32(state_ref, p_ref).astype(q_ref.dtype)


def dqn_action_kernel(state_ref, p_ref, a_ref, *, action_dim):
    """Fused epilogue: greedy argmax over the real q lanes -> (TB, 1) int32."""
    q = _mlp_q_f32(state_ref, p_ref)                          # (TB, 128) f32
    col = jax.lax.broadcasted_iota(jnp.int32, q.shape, 1)
    qm = jnp.where(col < action_dim, q, -jnp.inf)             # mask padded lanes
    m = jnp.max(qm, axis=-1, keepdims=True)
    idx = jnp.min(jnp.where(qm == m, col, jnp.int32(2 ** 30)),
                  axis=-1, keepdims=True)                     # first-max index
    a_ref[...] = idx.astype(jnp.int32)


# --------------------------------------------------------------------------- #
# Parameter packing (weight-only: call ONCE per weight update, not per forward)
# --------------------------------------------------------------------------- #
def pack_params(params):
    """Pack (w1,b1,w2,b2,w3,b3) into one lane-dense (S + 2*128 + 8, 128) array.

    Weights are stored (in, out) so the kernel computes y = x @ W + b
    (== PyTorch's y = x @ W.T + b with W stored (out, in)). Zero padding of the
    hidden/action lanes keeps the math exact (zero bias -> ReLU -> zero, and the
    padded weight rows/cols are zero).
    """
    w1, b1 = params["w1"], params["b1"]
    w2, b2 = params["w2"], params["b2"]
    w3, b3 = params["w3"], params["b3"]
    S, H = w1.shape
    A = w3.shape[1]
    assert S % 8 == 0 and H <= LANE and A <= LANE

    rows = S + 2 * LANE + 8            # biases occupy one 8-sublane group
    P = jnp.zeros((rows, LANE), jnp.float32)
    P = P.at[0:S, 0:H].set(w1)
    P = P.at[S:S + H, 0:H].set(w2)
    P = P.at[S + LANE:S + LANE + H, 0:A].set(w3)
    bo = S + 2 * LANE
    P = P.at[bo, 0:H].set(b1)
    P = P.at[bo + 1, 0:H].set(b2)
    P = P.at[bo + 2, 0:A].set(b3)
    return P


# --------------------------------------------------------------------------- #
# Tiling choice (adaptive, padding-aware, v7x-two-core friendly)
# --------------------------------------------------------------------------- #
def _choose_tiling(batch, block_batch):
    block_batch = max(8, (block_batch // 8) * 8)   # enforce (8,128) sublane rule
    bp8 = ((batch + 7) // 8) * 8
    if bp8 <= block_batch:
        return bp8, 1                              # single tile, <=7 pad rows
    n_tiles = (bp8 + block_batch - 1) // block_batch
    if n_tiles % 2 == 1:
        n_tiles += 1                               # even tile count -> both v7x TCs busy
    tb = (((bp8 + n_tiles - 1) // n_tiles) + 7) // 8 * 8
    return tb, n_tiles


def _common_specs(TB, S, rows, HP, n_tiles):
    grid_spec = pltpu.PrefetchScalarGridSpec(
        num_scalar_prefetch=0,
        grid=(n_tiles,),
        in_specs=[
            pl.BlockSpec((TB, S), lambda i: (i, 0)),      # batch-tiled state
            pl.BlockSpec((rows, HP), lambda i: (0, 0)),   # VMEM-resident weights
        ],
        out_specs=None,  # filled per-kernel below
    )
    return grid_spec


# --------------------------------------------------------------------------- #
# Wrappers
# --------------------------------------------------------------------------- #
def dqn_q_values(state, packed_params, action_dim, *, block_batch=1024):
    """state: (B, state_dim) f32, packed_params: pack_params(...) -> (B, action_dim)."""
    B, S = state.shape
    rows, HP = packed_params.shape
    TB, n_tiles = _choose_tiling(B, block_batch)
    Bp = TB * n_tiles
    if Bp != B:
        state = jnp.pad(state, ((0, Bp - B), (0, 0)))

    q_pad = pl.pallas_call(
        dqn_q_kernel,
        out_shape=jax.ShapeDtypeStruct((Bp, HP), jnp.float32),
        grid_spec=pltpu.PrefetchScalarGridSpec(
            num_scalar_prefetch=0,
            grid=(n_tiles,),
            in_specs=[
                pl.BlockSpec((TB, S), lambda i: (i, 0)),
                pl.BlockSpec((rows, HP), lambda i: (0, 0)),
            ],
            out_specs=pl.BlockSpec((TB, HP), lambda i: (i, 0)),
        ),
        compiler_params=pltpu.CompilerParams(
            dimension_semantics=("parallel",),
        ),
    )(state, packed_params)

    return q_pad[:B, :action_dim]


def dqn_greedy_action(state, packed_params, action_dim, *, block_batch=1024):
    """Fused q-value + argmax (greedy get_action path). Returns (B,) int32."""
    B, S = state.shape
    rows, HP = packed_params.shape
    TB, n_tiles = _choose_tiling(B, block_batch)
    Bp = TB * n_tiles
    if Bp != B:
        state = jnp.pad(state, ((0, Bp - B), (0, 0)))

    a_pad = pl.pallas_call(
        functools.partial(dqn_action_kernel, action_dim=action_dim),
        out_shape=jax.ShapeDtypeStruct((Bp, 1), jnp.int32),
        grid_spec=pltpu.PrefetchScalarGridSpec(
            num_scalar_prefetch=0,
            grid=(n_tiles,),
            in_specs=[
                pl.BlockSpec((TB, S), lambda i: (i, 0)),
                pl.BlockSpec((rows, HP), lambda i: (0, 0)),
            ],
            out_specs=pl.BlockSpec((TB, 1), lambda i: (i, 0)),
        ),
        compiler_params=pltpu.CompilerParams(
            dimension_semantics=("parallel",),
        ),
    )(state, packed_params)

    return a_pad[:B, 0]


# --------------------------------------------------------------------------- #
# Synthetic init + pure-JAX reference
# --------------------------------------------------------------------------- #
def init_params(key, state_dim=32, action_dim=10, hidden_dim=64):
    """Deterministic synthetic init (PyTorch-Linear-like uniform fan-in scaling)."""
    def linear(k, fan_in, fan_out):
        kw, kb = jax.random.split(k)
        bound = 1.0 / jnp.sqrt(fan_in)
        w = jax.random.uniform(kw, (fan_in, fan_out), jnp.float32, -bound, bound)
        b = jax.random.uniform(kb, (fan_out,), jnp.float32, -bound, bound)
        return w, b

    k1, k2, k3 = jax.random.split(key, 3)
    w1, b1 = linear(k1, state_dim, hidden_dim)
    w2, b2 = linear(k2, hidden_dim, hidden_dim)
    w3, b3 = linear(k3, hidden_dim, action_dim)
    return dict(w1=w1, b1=b1, w2=w2, b2=b2, w3=w3, b3=b3)


def reference_forward(state, params):
    h = jnp.maximum(state @ params["w1"] + params["b1"], 0.0)
    h = jnp.maximum(h @ params["w2"] + params["b2"], 0.0)
    return h @ params["w3"] + params["b3"]


# --------------------------------------------------------------------------- #
if __name__ == "__main__":
    key = jax.random.PRNGKey(0)
    k_state, k_params, k_big = jax.random.split(key, 3)

    batch, state_dim, action_dim, hidden_dim = 2, 32, 10, 64
    params = init_params(k_params, state_dim, action_dim, hidden_dim)

    # Pack weights ONCE (weight-only; only re-pack when weights change).
    packed = jax.block_until_ready(pack_params(params))

    q_fn = jax.jit(dqn_q_values, static_argnames=("action_dim", "block_batch"))
    act_fn = jax.jit(dqn_greedy_action, static_argnames=("action_dim", "block_batch"))

    # Small batch: single tile (TB=8, one grid step).
    state = jax.random.normal(k_state, (batch, state_dim), jnp.float32)
    q = jax.block_until_ready(q_fn(state, packed, action_dim=action_dim))
    q_ref = reference_forward(state, params)
    assert q.shape == (batch, action_dim)
    assert jnp.allclose(q, q_ref, atol=1e-5, rtol=1e-5)

    a = jax.block_until_ready(act_fn(state, packed, action_dim=action_dim))
    assert a.shape == (batch,)
    assert jnp.array_equal(a, jnp.argmax(q_ref, axis=-1).astype(jnp.int32))

    # Larger batch: B=1040 -> TB=520, 2 tiles, zero padding, even tile count.
    big_batch = 1040
    state_big = jax.random.normal(k_big, (big_batch, state_dim), jnp.float32)
    q_big = jax.block_until_ready(q_fn(state_big, packed, action_dim=action_dim))
    q_big_ref = reference_forward(state_big, params)
    assert q_big.shape == (big_batch, action_dim)
    assert jnp.allclose(q_big, q_big_ref, atol=1e-5, rtol=1e-5)

    a_big = jax.block_until_ready(act_fn(state_big, packed, action_dim=action_dim))
    assert a_big.shape == (big_batch,)
    assert jnp.array_equal(a_big, jnp.argmax(q_big_ref, axis=-1).astype(jnp.int32))

    print("KERNEL_OK")
</pallas_src>

<mosaic_0001>
module attributes {stable_mosaic.version = 11 : i64} {
  func.func @dqn_q_kernel(%arg0: i32, %arg1: memref<8x32xf32, #tpu.memory_space<vmem>>, %arg2: memref<296x128xf32, #tpu.memory_space<vmem>>, %arg3: memref<8x128xf32, #tpu.memory_space<vmem>>) attributes {dimension_semantics = [#tpu.dimension_semantics<parallel>], iteration_bounds = array<i64: 1>, scalar_prefetch = 0 : i64, scratch_operands = 0 : i64, tpu.core_type = #tpu.core_type<tc>, window_params = [{transform_indices = @transform_0, window_bounds = array<i64: 8, 32>}, {pipeline_mode = #tpu.pipeline_mode<synchronous>, transform_indices = @transform_1, window_bounds = array<i64: 296, 128>}, {transform_indices = @transform_2, window_bounds = array<i64: 8, 128>}]} {
    %c0 = arith.constant 0 : index
    %c0_0 = arith.constant 0 : index
    %0 = vector.load %arg1[%c0, %c0_0] : memref<8x32xf32, #tpu.memory_space<vmem>>, vector<8x32xf32>
    %c0_1 = arith.constant 0 : index
    %c0_2 = arith.constant 0 : index
    %1 = vector.load %arg2[%c0_1, %c0_2] : memref<296x128xf32, #tpu.memory_space<vmem>>, vector<32x128xf32>
    %c32 = arith.constant 32 : index
    %c0_3 = arith.constant 0 : index
    %2 = vector.load %arg2[%c32, %c0_3] : memref<296x128xf32, #tpu.memory_space<vmem>>, vector<128x128xf32>
    %c160 = arith.constant 160 : index
    %c0_4 = arith.constant 0 : index
    %3 = vector.load %arg2[%c160, %c0_4] : memref<296x128xf32, #tpu.memory_space<vmem>>, vector<128x128xf32>
    %c288 = arith.constant 288 : index
    %c0_5 = arith.constant 0 : index
    %4 = vector.load %arg2[%c288, %c0_5] : memref<296x128xf32, #tpu.memory_space<vmem>>, vector<1x128xf32>
    %c289 = arith.constant 289 : index
    %c0_6 = arith.constant 0 : index
    %5 = vector.load %arg2[%c289, %c0_6] : memref<296x128xf32, #tpu.memory_space<vmem>>, vector<1x128xf32>
    %c290 = arith.constant 290 : index
    %c0_7 = arith.constant 0 : index
    %6 = vector.load %arg2[%c290, %c0_7] : memref<296x128xf32, #tpu.memory_space<vmem>>, vector<1x128xf32>
    %cst = arith.constant dense<0.000000e+00> : vector<8x128xf32>
    %7 = tpu.matmul %0, %1, %cst {dimension_numbers = #tpu.dot_dimension_numbers<[1], [0], [0], [1], [0, 0, 1, 1], [], []>, precision = #tpu.contract_precision<fp32>} : vector<8x32xf32>, vector<32x128xf32>, vector<8x128xf32> -> vector<8x128xf32>
    %8 = vector.broadcast %4 : vector<1x128xf32> to vector<8x128xf32>
    %9 = arith.addf %7, %8 : vector<8x128xf32>
    %cst_8 = arith.constant 0.000000e+00 : f32
    %10 = vector.broadcast %cst_8 : f32 to vector<8x128xf32>
    %11 = arith.maximumf %9, %10 : vector<8x128xf32>
    %cst_9 = arith.constant dense<0.000000e+00> : vector<8x128xf32>
    %12 = tpu.matmul %11, %2, %cst_9 {dimension_numbers = #tpu.dot_dimension_numbers<[1], [0], [0], [1], [0, 0, 1, 1], [], []>, precision = #tpu.contract_precision<fp32>} : vector<8x128xf32>, vector<128x128xf32>, vector<8x128xf32> -> vector<8x128xf32>
    %13 = vector.broadcast %5 : vector<1x128xf32> to vector<8x128xf32>
    %14 = arith.addf %12, %13 : vector<8x128xf32>
    %cst_10 = arith.constant 0.000000e+00 : f32
    %15 = vector.broadcast %cst_10 : f32 to vector<8x128xf32>
    %16 = arith.maximumf %14, %15 : vector<8x128xf32>
    %cst_11 = arith.constant dense<0.000000e+00> : vector<8x128xf32>
    %17 = tpu.matmul %16, %3, %cst_11 {dimension_numbers = #tpu.dot_dimension_numbers<[1], [0], [0], [1], [0, 0, 1, 1], [], []>, precision = #tpu.contract_precision<fp32>} : vector<8x128xf32>, vector<128x128xf32>, vector<8x128xf32> -> vector<8x128xf32>
    %18 = vector.broadcast %6 : vector<1x128xf32> to vector<8x128xf32>
    %19 = arith.addf %17, %18 : vector<8x128xf32>
    %c0_12 = arith.constant 0 : index
    %c0_13 = arith.constant 0 : index
    %20 = vector.load %arg3[%c0_12, %c0_13] : memref<8x128xf32, #tpu.memory_space<vmem>>, vector<8x128xf32>
    tpu.vector_store %arg3[%c0_12, %c0_13], %19 {strides = array<i32>} : memref<8x128xf32, #tpu.memory_space<vmem>>, vector<8x128xf32>,
    return
  }
  func.func @transform_0(%arg0: i32) -> (i32, i32) {
    %c0_i32 = arith.constant 0 : i32
    %c0_i32_0 = arith.constant 0 : i32
    return %arg0, %c0_i32 : i32, i32
  }
  func.func @transform_1(%arg0: i32) -> (i32, i32) {
    %c0_i32 = arith.constant 0 : i32
    %c0_i32_0 = arith.constant 0 : i32
    %c0_i32_1 = arith.constant 0 : i32
    return %c0_i32, %c0_i32_0 : i32, i32
  }
  func.func @transform_2(%arg0: i32) -> (i32, i32) {
    %c0_i32 = arith.constant 0 : i32
    %c0_i32_0 = arith.constant 0 : i32
    return %arg0, %c0_i32 : i32, i32
  }
}

</mosaic_0001>

<bundles_post_ra>
// kernel: dqn_q_values.1
= control target key start
LH: loop header
LB: loop body
LE: loop exit
PB: predicated region body
PF: predicated region fallthrough
CT: control target
= control target key end

     0   :  { %7 = vsyncpa [#allocation3], 0  ;;  %s2965_s9 = smov [#allocation2]   ;;  %s3667_s0 = inlined_call_operand.vmem [shape: f32[8,32], index: 0, kind: input, shape index: {}]   ;;  %s3668_s1 = inlined_call_operand.hbm [shape: f32[296,128], index: 1, kind: input, shape index: {}]   ;;  %s3669_s2 = inlined_call_operand.vmem [shape: f32[8,128], index: 2, kind: output, shape index: {}]  }
   0x1   :  { %s15_s10 = sshll.u32 %s2965_s9, 4  ;;  %s2941_s13 = scalar_lea.hbm %s3668_s1, 4736  ;;  %s16_s10 = int_to_ptr.vmem [resolvable:$true] %s15_s10 }
   0x2   :  { %p2942_p0 = scmp.ne.s32.totalorder %s3668_s1, %s2941_s13  ;;  %p2945_p1 = scmp.lt.u32.totalorder %s2941_s13, %s3668_s1 }
   0x4   :  { %p2947_p2 = pnand %p2945_p1, %p2942_p0 }
   0x6   :  { %2950 = shalt.err (!%p2947_p2)
}
   0x7   :  { %s2951_s18 = scalar_lea.vmem %s16_s10, 4736  ;;  %p2956_p4 = scmp.lt.s32.totalorder %s16_s10, %s16_s10 }
   0x8   :  { %p2952_p3 = scmp.ne.s32.totalorder %s16_s10, %s2951_s18  ;;  %p2957_p5 = scmp.lt.s32.totalorder %s2951_s18, %s2951_s18 }
   0xa   :  { %p2958_p6 = por %p2957_p5, %p2956_p4 }
   0xc   :  { %p2959_p7 = pnand %p2958_p6, %p2952_p3 }
   0xe   :  { %2962 = shalt.err (!%p2959_p7)
}
   0xf   :  { %s2966_s19 = smov 128   ;;  %s2967_s20 = smov 8  }
  0x10   :  { %21 = dma.hbm_to_vmem [thread:$0]  %s3668_s1, 4736, %s16_s10, [#allocation3], %s2966_s19, %s2966_s19, %s2967_s20  }
  0x11   :  { %2963 = dma.done.wait [#allocation3], 4736  }
  0x12   :  { %2964 = vsyncadd [#allocation3], 4294962560  ;;  %v2968_v0 = vmov 0.0|0.0   ;;  %vm2969_vm0 = vmmov 0   ;;  %v3692_v1 = vmov 0.0   ;;  %vm69_vm1 = vcmask 261120  }
  0x13   :  { %2579 = vmatprep.subr.bf16.mxu0 %v2968_v0  ;;  %2101 = vmatprep.mubr.msk.f32.mxu0 %vm2969_vm0, %v3692_v1  ;;  %v26_v2 = vld [vmem:[#allocation2] sm:$0xff]  ;;  %v27_v3 = vld [vmem:[#allocation2 + $0x8] sm:$0xff]  ;;  %v28_v4 = vld [vmem:[#allocation2 + $0x10] sm:$0xff] }
  0x14   :  { %2615 = vmatprep.subr.bf16.mxu1 %v2968_v0  ;;  %2191 = vmatprep.mubr.msk.f32.mxu1 %vm2969_vm0, %v3692_v1  ;;  %v74_v5 = vand.u32 4294901760, %v26_v2  ;;  %v77_v6 = vand.u32 4294901760, %v27_v3  ;;  %v29_v7 = vld [vmem:[#allocation2 + $0x18] sm:$0xff]  ;;  %v80_v8 = vand.u32 4294901760, %v28_v4  ;;  %v25_v9 = vld [vmem:[%s3667_s0] sm:$0xff]  ;;  %v31_v13 = vld [vmem:[#allocation2 + $0x28] sm:$0xff] }
  0x15   :  { %v30_v10 = vld [vmem:[#allocation2 + $0x20] sm:$0xff]  ;;  %v83_v11 = vand.u32 4294901760, %v29_v7  ;;  %v71_v12 = vsel %vm69_vm1, %v25_v9, 0  ;;  %v567_v21 = vand.u32 4294901760, %v31_v13  ;;  %v32_v32 = vld [vmem:[#allocation2 + $0x30] sm:$0xff]  ;;  %v33_v33 = vld [vmem:[#allocation2 + $0x38] sm:$0xff] }
  0x16   :  { %v564_v14 = vand.u32 4294901760, %v30_v10  ;;  %v3007_v15 = vpack.c.bf16 %v77_v6, %v74_v5  ;;  %v3009_v16 = vsub.f32 %v26_v2, %v74_v5  ;;  %v3011_v17 = vsub.f32 %v27_v3, %v77_v6  ;;  %v34_v37 = vld [vmem:[#allocation2 + $0x40] sm:$0xff]  ;;  %v35_v38 = vld [vmem:[#allocation2 + $0x48] sm:$0xff]  ;;  %v36_v42 = vld [vmem:[#allocation2 + $0x50] sm:$0xff] }
  0x17   :  { %v3013_v18 = vsub.f32 %v28_v4, %v80_v8  ;;  %v3015_v19 = vsub.f32 %v29_v7, %v83_v11  ;;  %v3017_v20 = vand.u32 4294901760, %v71_v12  ;;  %v3020_v22 = vpack.c.bf16 %v83_v11, %v80_v8  ;;  %v37_v51 = vld [vmem:[#allocation2 + $0x58] sm:$0xff]  ;;  %v38_v56 = vld [vmem:[#allocation2 + $0x60] sm:$0xff]  ;;  %v39_v57 = vld [vmem:[#allocation2 + $0x68] sm:$0xff] }
  0x18   :  { %2581 = vmatpush3.bf16.msra.mxu0 %v3007_v15  ;;  %v155_v23 = vand.u32 4294901760, %v3009_v16  ;;  %v162_v24 = vand.u32 4294901760, %v3011_v17  ;;  %v3030_v28 = vpack.c.bf16 %v567_v21, %v564_v14  ;;  %v3046_v36 = vsub.f32 %v30_v10, %v564_v14  ;;  %v40_v14 = vld [vmem:[#allocation2 + $0x70] sm:$0xff] }
  0x19   :  { %v169_v25 = vand.u32 4294901760, %v3013_v18  ;;  %2582 = vmatprep.subr.bf16.mxu0 %v2968_v0  ;;  %v3027_v26 = vsub.f32 %v71_v12, %v3017_v20  ;;  %v176_v27 = vand.u32 4294901760, %v3015_v19  ;;  %v3049_v41 = vsub.f32 %v31_v13, %v567_v21  ;;  %v43_v21 = vld [vmem:[#allocation2 + $0x88] sm:$0xff] }
  0x1a   :  { %v156_v29 = vsub.f32 %v3009_v16, %v155_v23  ;;  %v163_v30 = vsub.f32 %v3011_v17, %v162_v24  ;;  %2617 = vmatpush3.bf16.msra.mxu1 %v3030_v28  ;;  %v570_v45 = vand.u32 4294901760, %v32_v32  ;;  %v573_v46 = vand.u32 4294901760, %v33_v33 }
  0x1b   :  { %v170_v31 = vsub.f32 %v3013_v18, %v169_v25  ;;  %v144_v34 = vand.u32 4294901760, %v3027_v26  ;;  %v177_v35 = vsub.f32 %v3015_v19, %v176_v27  ;;  %2618 = vmatprep.subr.bf16.mxu1 %v2968_v0  ;;  %v576_v49 = vand.u32 4294901760, %v34_v37 }
  0x1c   :  { %2584 = vmatpush3.bf16.msra.mxu0 %v3020_v22  ;;  %v157_v39 = vand.u32 4294901760, %v156_v29  ;;  %v164_v40 = vand.u32 4294901760, %v163_v30  ;;  %v579_v50 = vand.u32 4294901760, %v35_v38  ;;  %v3056_v53 = vpack.c.bf16 %v573_v46, %v570_v45 }
  0x1d   :  { %v145_v43 = vsub.f32 %v3027_v26, %v144_v34  ;;  %2585 = vmatprep.subr.bf16.mxu0 %v2968_v0  ;;  %v171_v44 = vand.u32 4294901760, %v170_v31  ;;  %v178_v48 = vand.u32 4294901760, %v177_v35  ;;  %v3058_v54 = vsub.f32 %v32_v32, %v570_v45 }
  0x1e   :  { %v2586_v47 = vpack.c.bf16 %v164_v40, %v157_v39  ;;  %v582_v55 = vand.u32 4294901760, %v36_v42  ;;  %v3060_v58 = vsub.f32 %v33_v33, %v573_v46  ;;  %v3062_v59 = vsub.f32 %v34_v37, %v576_v49  ;;  %2620 = vmatpush3.bf16.msra.mxu1 %v3056_v53 }
  0x1f   :  { %v146_v52 = vand.u32 4294901760, %v145_v43  ;;  %v3064_v60 = vsub.f32 %v35_v38, %v579_v50  ;;  %v3067_v61 = vpack.c.bf16 %v579_v50, %v576_v49  ;;  %v585_v62 = vand.u32 4294901760, %v37_v51  ;;  %2621 = vmatprep.subr.bf16.mxu1 %v2968_v0 }
  0x20   :  { %v3069_v63 = vsub.f32 %v36_v42, %v582_v55  ;;  %v2589_v2 = vpack.c.bf16 %v178_v48, %v171_v44  ;;  %v588_v3 = vand.u32 4294901760, %v38_v56  ;;  %v591_v4 = vand.u32 4294901760, %v39_v57 }
  0x21   :  { %2102 = vmatmul.mubr.f32.vlgmr.msra.gmra.mrb[0].mxu0 %v146_v52  ;;  %v3075_v5 = vsub.f32 %v37_v51, %v585_v62  ;;  %v3082_v8 = vpack.c.bf16 %v585_v62, %v582_v55  ;;  %v2592_v9 = vpack.c.bf16 %v3011_v17, %v3009_v16  ;;  %v2595_v11 = vpack.c.bf16 %v3015_v19, %v3013_v18  ;;  %v41_v16 = vld [vmem:[#allocation2 + $0x78] sm:$0xff] }
  0x22   :  { %2587 = vmatpush3.bf16.msra.mxu0 %v2586_v47  ;;  %2112 = vmatprep.mubr.msk.f32.mxu0 %vm2969_vm0, %v3692_v1  ;;  %v3077_v6 = vsub.f32 %v38_v56, %v588_v3  ;;  %v3079_v7 = vsub.f32 %v39_v57, %v591_v4  ;;  %v3090_v10 = vpack.c.bf16 %v591_v4, %v588_v3  ;;  %v594_v17 = vand.u32 4294901760, %v40_v14 }
  0x23   :  { %2588 = vmatprep.subr.bf16.mxu0 %v2968_v0  ;;  %2623 = vmatpush3.bf16.msra.mxu1 %v3067_v61  ;;  %v2604_v12 = vpack.c.bf16 %v162_v24, %v155_v23  ;;  %v2607_v13 = vpack.c.bf16 %v176_v27, %v169_v25  ;;  %v597_v18 = vand.u32 4294901760, %v41_v16  ;;  %v603_v24 = vand.u32 4294901760, %v43_v21  ;;  %v45_v25 = vld [vmem:[#allocation2 + $0x98] sm:$0xff] }
  0x24   :  { %2624 = vmatprep.subr.bf16.mxu1 %v2968_v0  ;;  %v609_v32 = vand.u32 4294901760, %v45_v25  ;;  %v3690_v33 = vand.u32 4294901760, %v3046_v36  ;;  %v3683_v43 = vand.u32 4294901760, %v3058_v54  ;;  %v3682_v44 = vand.u32 4294901760, %v3060_v58 }
  0x25   :  { %v3132_v19 = vpack.c.bf16 %v597_v18, %v594_v17  ;;  %v3140_v27 = vsub.f32 %v41_v16, %v597_v18  ;;  %v3145_v30 = vsub.f32 %v43_v21, %v603_v24  ;;  %v3681_v51 = vand.u32 4294901760, %v3062_v59 }
  0x26   :  { %2590 = vmatpush3.bf16.msra.mxu0 %v2589_v2  ;;  %v3154_v38 = vsub.f32 %v45_v25, %v609_v32  ;;  %v658_v39 = vsub.f32 %v3046_v36, %v3690_v33  ;;  %v672_v46 = vsub.f32 %v3058_v54, %v3683_v43  ;;  %v679_v47 = vsub.f32 %v3060_v58, %v3682_v44  ;;  %v3312_v33 = vld [vmem:[#allocation2 + $0xe8] sm:$0xff] }
  0x27   :  { %2591 = vmatprep.subr.bf16.mxu0 %v2968_v0  ;;  %2626 = vmatpush3.bf16.msra.mxu1 %v3082_v8  ;;  %v3680_v52 = vand.u32 4294901760, %v3064_v60  ;;  %v686_v56 = vsub.f32 %v3062_v59, %v3681_v51  ;;  %v3679_v3 = vand.u32 4294901760, %v3069_v63  ;;  %v3678_v4 = vand.u32 4294901760, %v3075_v5 }
  0x28   :  { %2627 = vmatprep.subr.bf16.mxu1 %v2968_v0  ;;  %v659_v42 = vand.u32 4294901760, %v658_v39  ;;  %v673_v49 = vand.u32 4294901760, %v672_v46  ;;  %v680_v50 = vand.u32 4294901760, %v679_v47  ;;  %v3677_v16 = vand.u32 4294901760, %v3077_v6 }
  0x29   :  { %2113 = vmatmul.mubr.f32.vlgmr.msra.gmra.mrb[0].mxu0 %v3017_v20  ;;  %v693_v57 = vsub.f32 %v3064_v60, %v3680_v52  ;;  %v687_v62 = vand.u32 4294901760, %v686_v56  ;;  %v3674_v25 = vand.u32 4294901760, %v3140_v27  ;;  %v3672_v46 = vand.u32 4294901760, %v3145_v30 }
  0x2a   :  { %2593 = vmatpush3.bf16.msra.mxu0 %v2592_v9  ;;  %2123 = vmatprep.mubr.msk.f32.mxu0 %vm2969_vm0, %v3692_v1  ;;  %v2643_v55 = vpack.c.bf16 %v680_v50, %v673_v49 }
  0x2b   :  { %2594 = vmatprep.subr.bf16.mxu0 %v2968_v0  ;;  %2629 = vmatpush3.bf16.msra.mxu1 %v3090_v10  ;;  %v694_v2 = vand.u32 4294901760, %v693_v57  ;;  %v735_v39 = vsub.f32 %v3140_v27, %v3674_v25  ;;  %v749_v50 = vsub.f32 %v3145_v30, %v3672_v46 }
  0x2c   :  { %2630 = vmatprep.subr.bf16.mxu1 %v2968_v0 }
  0x2d   :  { %v2646_v9 = vpack.c.bf16 %v694_v2, %v687_v62  ;;  %v750_v57 = vand.u32 4294901760, %v749_v50  ;;  %v3670_v2 = vand.u32 4294901760, %v3154_v38 }
  0x2e   :  { %2596 = vmatpush3.bf16.msra.mxu0 %v2595_v11  ;;  %v700_v11 = vsub.f32 %v3069_v63, %v3679_v3 }
  0x2f   :  { %2597 = vmatprep.subr.bf16.mxu0 %v2968_v0  ;;  %2632 = vmatpush3.bf16.msra.mxu1 %v3132_v19 }
  0x30   :  { %2633 = vmatprep.subr.bf16.mxu1 %v2968_v0 }
  0x31   :  { %2124 = vmatmul.mubr.f32.vlgmr.msra.gmra.mrb[0].mxu0 %v3027_v26  ;;  %v3138_v26 = vsub.f32 %v40_v14, %v594_v17  ;;  %v3676_v17 = vand.u32 4294901760, %v3079_v7 }
  0x32   :  { %2599 = vmatpush3.bf16.msra.mxu0 %v3007_v15  ;;  %2134 = vmatprep.mubr.msk.f32.mxu0 %vm2969_vm0, %v3692_v1 }
  0x33   :  { %2600 = vmatprep.subr.bf16.mxu0 %v2968_v0  ;;  %v721_v21 = vsub.f32 %v3079_v7, %v3676_v17 }
  0x36   :  { %2602 = vmatpush3.bf16.msra.mxu0 %v3020_v22 }
  0x37   :  { %2603 = vmatprep.subr.bf16.mxu0 %v2968_v0 }
  0x39   :  { %2135 = vmatmul.mubr.f32.vlgmr.msra.gmra.mrb[0].mxu0 %v144_v34  ;;  %v3688_v34 = vand.u32 4294901760, %v3049_v41 }
  0x3a   :  { %2605 = vmatpush3.bf16.msra.mxu0 %v2604_v12  ;;  %2145 = vmatprep.mubr.msk.f32.mxu0 %vm2969_vm0, %v3692_v1  ;;  %v707_v12 = vsub.f32 %v3075_v5, %v3678_v4 }
  0x3b   :  { %2606 = vmatprep.subr.bf16.mxu0 %v2968_v0  ;;  %v665_v40 = vsub.f32 %v3049_v41, %v3688_v34 }
  0x3c   :  { %v708_v14 = vand.u32 4294901760, %v707_v12 }
  0x3d   :  { %v666_v45 = vand.u32 4294901760, %v665_v40 }
  0x3e   :  { %2608 = vmatpush3.bf16.msra.mxu0 %v2607_v13  ;;  %v701_v13 = vand.u32 4294901760, %v700_v11 }
  0x3f   :  { %2609 = vmatprep.subr.bf16.mxu0 %v2968_v0  ;;  %v3172_v48 = vpack.c.bf16 %v666_v45, %v659_v42  ;;  %v736_v42 = vand.u32 4294901760, %v735_v39  ;;  %v2673_v39 = vpack.c.bf16 %v3075_v5, %v3069_v63 }
  0x40   :  { %v2649_v18 = vpack.c.bf16 %v708_v14, %v701_v13  ;;  %v763_v13 = vsub.f32 %v3154_v38, %v3670_v2 }
  0x41   :  { %2146 = vmatmul.mubr.f32.vlgmr.msra.gmra.mrb[0].mxu0 %v3017_v20 }
  0x42   :  { %2611 = vmatpush3.bf16.msra.mxu0 %v3007_v15  ;;  %2156 = vmatprep.mubr.msk.f32.mxu0 %vm2969_vm0, %v3692_v1  ;;  %v42_v15 = vld [vmem:[#allocation2 + $0x80] sm:$0xff] }
  0x43   :  { %2612 = vmatprep.subr.bf16.mxu0 %v2968_v0  ;;  %v600_v23 = vand.u32 4294901760, %v42_v15 }
  0x45   :  { %v3143_v29 = vsub.f32 %v42_v15, %v600_v23  ;;  %v714_v15 = vsub.f32 %v3077_v6, %v3677_v16 }
  0x46   :  { %2614 = vmatpush3.bf16.msra.mxu0 %v3020_v22  ;;  %v3136_v22 = vpack.c.bf16 %v603_v24, %v600_v23  ;;  %v722_v24 = vand.u32 4294901760, %v721_v21 }
  0x47   :  { %2783 = vmatprep.subr.bf16.mxu0 %v2968_v0  ;;  %v715_v23 = vand.u32 4294901760, %v714_v15  ;;  %v3673_v45 = vand.u32 4294901760, %v3143_v29  ;;  %v764_v15 = vand.u32 4294901760, %v763_v13 }
  0x48   :  { %2635 = vmatpush3.bf16.msra.mxu1 %v3136_v22 }
  0x49   :  { %2157 = vmatmul.mubr.f32.vlgmr.msra.gmra.mrb[0].mxu0 %v3017_v20  ;;  %v44_v20 = vld [vmem:[#allocation2 + $0x90] sm:$0xff]  ;;  %2636 = vmatprep.subr.bf16.mxu1 %v2968_v0  ;;  %v742_v49 = vsub.f32 %v3143_v29, %v3673_v45 }
  0x4a   :  { %2436 = vmatprep.mubr.msk.f32.mxu0 %vm2969_vm0, %v3692_v1  ;;  %v606_v31 = vand.u32 4294901760, %v44_v20 }
  0x4b   :  { %v743_v56 = vand.u32 4294901760, %v742_v49 }
  0x4c   :  { %v3150_v35 = vpack.c.bf16 %v609_v32, %v606_v31  ;;  %v3152_v37 = vsub.f32 %v44_v20, %v606_v31  ;;  %v3675_v20 = vand.u32 4294901760, %v3138_v26  ;;  %v2652_v31 = vpack.c.bf16 %v722_v24, %v715_v23 }
  0x4d   :  { %v2658_v11 = vpack.c.bf16 %v750_v57, %v743_v56  ;;  %v2664_v23 = vpack.c.bf16 %v3049_v41, %v3046_v36  ;;  %v2667_v24 = vpack.c.bf16 %v3060_v58, %v3058_v54  ;;  %v1856_v56 = vld [vmem:[#allocation2 + $0x120] ss:$0 sm:$0xff] }
  0x4e   :  { %2638 = vmatpush3.bf16.msra.mxu1 %v3150_v35  ;;  %v728_v32 = vsub.f32 %v3138_v26, %v3675_v20  ;;  %v3671_v62 = vand.u32 4294901760, %v3152_v37 }
  0x4f   :  { %2639 = vmatprep.subr.bf16.mxu1 %v2968_v0 }
  0x50   :  { %v729_v40 = vand.u32 4294901760, %v728_v32  ;;  %v756_v12 = vsub.f32 %v3152_v37, %v3671_v62  ;;  %v2670_v32 = vpack.c.bf16 %v3064_v60, %v3062_v59 }
  0x52   :  { %v2655_v47 = vpack.c.bf16 %v736_v42, %v729_v40  ;;  %v757_v14 = vand.u32 4294901760, %v756_v12  ;;  %v3320_v40 = vld [vmem:[#allocation2 + $0xf8] sm:$0xff] }
  0x54   :  { %v2661_v21 = vpack.c.bf16 %v764_v15, %v757_v14 }
 0x11c   :  { %v554_v57 = vpop.f32.mrb[0].mxu0 }
 0x11d   :  { %v2903_v12 = vadd.f32 %v1856_v56, %v554_v57  ;;  %v2158_v13 = vpop.f32.mrb[1].mxu0 }
 0x11e   :  { %v53_v13 = vld [vmem:[#allocation2 + $0xd8] sm:$0xff] }
 0x11f   :  { %v558_v14 = vmax.f32 %v2903_v12, 0.0  ;;  %v52_v12 = vld [vmem:[#allocation2 + $0xd0] sm:$0xff] }
 0x120   :  { %v1228_v3 = vand.u32 4294901760, %v52_v12 }
 0x121   :  { %v3238_v15 = vand.u32 4294901760, %v558_v14 }
 0x123   :  { %v3241_v2 = vsub.f32 %v558_v14, %v3238_v15 }
 0x125   :  { %v3686_v62 = vand.u32 4294901760, %v3241_v2 }
 0x127   :  { %v647_v46 = vsub.f32 %v3241_v2, %v3686_v62  ;;  %v3306_v62 = vld [vmem:[#allocation2 + $0xe0] sm:$0xff] }
 0x128   :  { %v3700_v42 = vand.u32 4294901760, %v3306_v62 }
 0x129   :  { %v648_v45 = vand.u32 4294901760, %v647_v46 }
 0x12b   :  { %2192 = vmatmul.mubr.f32.vlgmr.msra.gmra.mrb[0].mxu1 %v648_v45  ;;  %v49_v45 = vld [vmem:[#allocation2 + $0xb8] sm:$0xff] }
 0x12c   :  { %2641 = vmatpush3.bf16.msra.mxu1 %v3172_v48  ;;  %2226 = vmatprep.mubr.msk.f32.mxu1 %vm2969_vm0, %v3692_v1  ;;  %v46_v48 = vld [vmem:[#allocation2 + $0xa0] sm:$0xff] }
 0x12d   :  { %2642 = vmatprep.subr.bf16.mxu1 %v2968_v0 }
 0x130   :  { %2644 = vmatpush3.bf16.msra.mxu1 %v2643_v55  ;;  %v47_v55 = vld [vmem:[#allocation2 + $0xa8] sm:$0xff] }
 0x131   :  { %2645 = vmatprep.subr.bf16.mxu1 %v2968_v0 }
 0x134   :  { %2647 = vmatpush3.bf16.msra.mxu1 %v2646_v9  ;;  %v48_v9 = vld [vmem:[#allocation2 + $0xb0] sm:$0xff] }
 0x135   :  { %2648 = vmatprep.subr.bf16.mxu1 %v2968_v0  ;;  %v1216_v46 = vand.u32 4294901760, %v48_v9 }
 0x138   :  { %2650 = vmatpush3.bf16.msra.mxu1 %v2649_v18  ;;  %v1210_v18 = vand.u32 4294901760, %v46_v48 }
 0x139   :  { %2651 = vmatprep.subr.bf16.mxu1 %v2968_v0 }
 0x13a   :  { %v3262_v14 = vsub.f32 %v46_v48, %v1210_v18 }
 0x13c   :  { %2653 = vmatpush3.bf16.msra.mxu1 %v2652_v31  ;;  %v1213_v31 = vand.u32 4294901760, %v47_v55  ;;  %v3684_v52 = vand.u32 4294901760, %v3262_v14 }
 0x13d   :  { %2654 = vmatprep.subr.bf16.mxu1 %v2968_v0 }
 0x13e   :  { %v3264_v25 = vsub.f32 %v47_v55, %v1213_v31  ;;  %v3268_v20 = vpack.c.bf16 %v1213_v31, %v1210_v18  ;;  %v1231_v55 = vand.u32 4294901760, %v53_v13 }
 0x140   :  { %2656 = vmatpush3.bf16.msra.mxu1 %v2655_v47  ;;  %v50_v47 = vld [vmem:[#allocation2 + $0xc0] sm:$0xff]  ;;  %v3685_v51 = vand.u32 4294901760, %v3264_v25  ;;  %v3294_v44 = vsub.f32 %v53_v13, %v1231_v55 }
 0x141   :  { %2657 = vmatprep.subr.bf16.mxu1 %v2968_v0  ;;  %v1222_v56 = vand.u32 4294901760, %v50_v47 }
 0x143   :  { %v3272_v16 = vsub.f32 %v50_v47, %v1222_v56  ;;  %v1311_v47 = vsub.f32 %v3264_v25, %v3685_v51 }
 0x144   :  { %2659 = vmatpush3.bf16.msra.mxu1 %v2658_v11  ;;  %v51_v11 = vld [vmem:[#allocation2 + $0xc8] sm:$0xff] }
 0x145   :  { %2660 = vmatprep.subr.bf16.mxu1 %v2968_v0  ;;  %v1225_v57 = vand.u32 4294901760, %v51_v11  ;;  %v3691_v18 = vand.u32 4294901760, %v3272_v16 }
 0x147   :  { %v3274_v4 = vsub.f32 %v51_v11, %v1225_v57 }
 0x148   :  { %2662 = vmatpush3.bf16.msra.mxu1 %v2661_v21  ;;  %v1219_v21 = vand.u32 4294901760, %v49_v45 }
 0x149   :  { %2663 = vmatprep.subr.bf16.mxu1 %v2968_v0  ;;  %v3694_v31 = vand.u32 4294901760, %v3274_v4 }
 0x14a   :  { %v3270_v17 = vsub.f32 %v49_v45, %v1219_v21  ;;  %v3283_v45 = vsub.f32 %v52_v12, %v1228_v3  ;;  %v1332_v12 = vsub.f32 %v3272_v16, %v3691_v18  ;;  %v3317_v49 = vpack.c.bf16 %v1219_v21, %v1216_v46 }
 0x14b   :  { %2227 = vmatmul.mubr.f32.vlgmr.msra.gmra.mrb[0].mxu1 %v3238_v15  ;;  %v3337_v21 = vpack.c.bf16 %v1225_v57, %v1222_v56 }
 0x14c   :  { %2665 = vmatpush3.bf16.msra.mxu1 %v2664_v23  ;;  %2261 = vmatprep.mubr.msk.f32.mxu1 %vm2969_vm0, %v3692_v1  ;;  %v3266_v23 = vsub.f32 %v48_v9, %v1216_v46  ;;  %v3689_v9 = vand.u32 4294901760, %v3270_v17  ;;  %v3696_v51 = vand.u32 4294901760, %v3283_v45  ;;  %v3315_v1 = vld [vmem:[#allocation2 + $0xf0] sm:$0xff]  ;;  %v1333_v50 = vand.u32 4294901760, %v1332_v12 }
 0x14d   :  { %2666 = vmatprep.subr.bf16.mxu1 %v2968_v0 }
 0x14e   :  { %v3687_v48 = vand.u32 4294901760, %v3266_v23  ;;  %v1325_v43 = vsub.f32 %v3270_v17, %v3689_v9  ;;  %v3695_v9 = vand.u32 4294901760, %v3294_v44 }
 0x150   :  { %2668 = vmatpush3.bf16.msra.mxu1 %v2667_v24  ;;  %v1304_v24 = vsub.f32 %v3262_v14, %v3684_v52  ;;  %v1318_v11 = vsub.f32 %v3266_v23, %v3687_v48  ;;  %v1339_v52 = vsub.f32 %v3274_v4, %v3694_v31  ;;  %v1312_v48 = vand.u32 4294901760, %v1311_v47 }
 0x151   :  { %2669 = vmatprep.subr.bf16.mxu1 %v2968_v0  ;;  %v1326_v18 = vand.u32 4294901760, %v1325_v43  ;;  %v1353_v47 = vsub.f32 %v3294_v44, %v3695_v9  ;;  %v3697_v43 = vand.u32 4294901760, %v3312_v33 }
 0x152   :  { %v1305_v13 = vand.u32 4294901760, %v1304_v24  ;;  %v1319_v34 = vand.u32 4294901760, %v1318_v11  ;;  %v1346_v24 = vsub.f32 %v3283_v45, %v3696_v51  ;;  %v3710_v51 = vpack.c.bf16 %v3079_v7, %v3077_v6 }
 0x153   :  { %v3345_v11 = vsub.f32 %v3312_v33, %v3697_v43 }
 0x154   :  { %2671 = vmatpush3.bf16.msra.mxu1 %v2670_v32  ;;  %v2784_v31 = vpack.c.bf16 %v1312_v48, %v1305_v13  ;;  %v1340_v32 = vand.u32 4294901760, %v1339_v52  ;;  %v2787_v46 = vpack.c.bf16 %v1326_v18, %v1319_v34  ;;  %v3335_v52 = vsub.f32 %v3306_v62, %v3700_v42  ;;  %v3350_v18 = vld [vmem:[#allocation2 + $0x100] sm:$0xff] }
 0x155   :  { %2672 = vmatprep.subr.bf16.mxu1 %v2968_v0  ;;  %v3698_v48 = vand.u32 4294901760, %v3315_v1  ;;  %3709 = vst [vmem:[#allocation5_spill] sm:$0xff] %v3345_v11  ;;  %v3699_v34 = vand.u32 4294901760, %v3320_v40  ;;  %v3703_v12 = vand.u32 4294901760, %v3350_v18  ;;  %v3702_v9 = vand.u32 4294901760, %v3345_v11 }
 0x156   :  { %2785 = vmatpush3.bf16.msra.mxu0 %v2784_v31  ;;  %v3352_v31 = vld [vmem:[#allocation2 + $0x108] sm:$0xff]  ;;  %v3701_v56 = vand.u32 4294901760, %v3335_v52  ;;  %v2790_v13 = vpack.c.bf16 %v1340_v32, %v1333_v50  ;;  %v1347_v43 = vand.u32 4294901760, %v1346_v24 }
 0x157   :  { %2786 = vmatprep.subr.bf16.mxu0 %v2968_v0  ;;  %v3358_v57 = vsub.f32 %v3315_v1, %v3698_v48  ;;  %v1354_v48 = vand.u32 4294901760, %v1353_v47  ;;  %v3711_v47 = vpack.c.bf16 %v3140_v27, %v3138_v26 }
 0x158   :  { %2674 = vmatpush3.bf16.msra.mxu1 %v2673_v39  ;;  %v3348_v39 = vpack.c.bf16 %v1231_v55, %v1228_v3  ;;  %v3365_v3 = vsub.f32 %v3320_v40, %v3699_v34  ;;  %v3704_v55 = vand.u32 4294901760, %v3352_v31  ;;  %v1360_v50 = vsub.f32 %v3335_v52, %v3701_v56 }
 0x159   :  { %2675 = vmatprep.subr.bf16.mxu1 %v2968_v0  ;;  %v3708_v32 = vand.u32 4294901760, %v3358_v57  ;;  %v1367_v34 = vsub.f32 %v3345_v11, %v3702_v9 }
 0x15a   :  { %2788 = vmatpush3.bf16.msra.mxu0 %v2787_v46  ;;  %v3707_v42 = vand.u32 4294901760, %v3365_v3  ;;  %v3389_v24 = vsub.f32 %v3352_v31, %v3704_v55  ;;  %v2793_v46 = vpack.c.bf16 %v1354_v48, %v1347_v43  ;;  %v1361_v56 = vand.u32 4294901760, %v1360_v50 }
 0x15b   :  { %2789 = vmatprep.subr.bf16.mxu0 %v2968_v0  ;;  %v1368_v9 = vand.u32 4294901760, %v1367_v34  ;;  %v3712_v43 = vpack.c.bf16 %v3145_v30, %v3143_v29 }
 0x15c   :  { %2677 = vmatpush3.bf16.msra.mxu1 %v3710_v51  ;;  %v3384_v51 = vsub.f32 %v3350_v18, %v3703_v12  ;;  %v1374_v12 = vsub.f32 %v3358_v57, %v3708_v32  ;;  %v1381_v55 = vsub.f32 %v3365_v3, %v3707_v42  ;;  %v3713_v32 = vpack.c.bf16 %v3154_v38, %v3152_v37 }
 0x15d   :  { %2678 = vmatprep.subr.bf16.mxu1 %v2968_v0  ;;  %v2796_v48 = vpack.c.bf16 %v1368_v9, %v1361_v56 }
 0x15e   :  { %2791 = vmatpush3.bf16.msra.mxu0 %v2790_v13  ;;  %v1387_v11 = vand.u32 4294901760, %v3384_v51  ;;  %v1375_v34 = vand.u32 4294901760, %v1374_v12  ;;  %v1382_v13 = vand.u32 4294901760, %v1381_v55  ;;  %v3714_v55 = vmov 0.0  }
 0x15f   :  { %2792 = vmatprep.subr.bf16.mxu0 %v2968_v0 }
 0x160   :  { %2680 = vmatpush3.bf16.msra.mxu1 %v3711_v47  ;;  %v1394_v47 = vand.u32 4294901760, %v3389_v24  ;;  %v1388_v50 = vsub.f32 %v3384_v51, %v1387_v11  ;;  %v2799_v9 = vpack.c.bf16 %v1382_v13, %v1375_v34  ;;  %v3718_v34 = vand.u32 4294901760, %v3058_v54 }
 0x161   :  { %2681 = vmatprep.subr.bf16.mxu1 %v2968_v0  ;;  %v3719_v13 = vand.u32 4294901760, %v3060_v58  ;;  %v3723_v54 = vand.u32 4294901760, %v3075_v5  ;;  %v3729_v5 = vand.u32 4294901760, %v3145_v30  ;;  %v3732_v30 = vand.u32 4294901760, %v3306_v62 }
 0x162   :  { %2794 = vmatpush3.bf16.msra.mxu0 %v2793_v46  ;;  %v1395_v42 = vsub.f32 %v3389_v24, %v1394_v47  ;;  %v1389_v56 = vand.u32 4294901760, %v1388_v50  ;;  %v3737_v62 = vand.u32 4294901760, %v3352_v31  ;;  %v2808_v31 = vpack.c.bf16 %v3264_v25, %v3262_v14 }
 0x163   :  { %2795 = vmatprep.subr.bf16.mxu0 %v2968_v0  ;;  %v2715_v50 = vpack.c.bf16 %v3719_v13, %v3718_v34  ;;  %v3734_v34 = vand.u32 4294901760, %v3315_v1  ;;  %v3735_v13 = vand.u32 4294901760, %v3320_v40 }
 0x164   :  { %2683 = vmatpush3.bf16.msra.mxu1 %v3712_v43  ;;  %v1396_v12 = vand.u32 4294901760, %v1395_v42  ;;  %v3715_v42 = vand.u32 4294901760, %v3046_v36  ;;  %v3720_v36 = vand.u32 4294901760, %v3062_v59  ;;  %v3726_v59 = vand.u32 4294901760, %v3138_v26 }
 0x165   :  { %2684 = vmatprep.subr.bf16.mxu1 %v2968_v0 }
 0x166   :  { %2797 = vmatpush3.bf16.msra.mxu0 %v2796_v48  ;;  %v2802_v46 = vpack.c.bf16 %v1396_v12, %v1389_v56  ;;  %v3717_v48 = vand.u32 4294901760, %v3241_v2  ;;  %v3724_v56 = vand.u32 4294901760, %v3077_v6  ;;  %v3725_v12 = vand.u32 4294901760, %v3079_v7 }
 0x167   :  { %2798 = vmatprep.subr.bf16.mxu0 %v2968_v0  ;;  %v3730_v6 = vand.u32 4294901760, %v3152_v37  ;;  %v3731_v7 = vand.u32 4294901760, %v3154_v38 }
 0x168   :  { %2686 = vmatpush3.bf16.msra.mxu1 %v3713_v32  ;;  %v3716_v32 = vand.u32 4294901760, %v3049_v41  ;;  %v3721_v41 = vand.u32 4294901760, %v3064_v60  ;;  %v3727_v60 = vand.u32 4294901760, %v3140_v27 }
 0x169   :  { %2687 = vmatprep.subr.bf16.mxu1 %v2968_v0 }
 0x16a   :  { %2800 = vmatpush3.bf16.msra.mxu0 %v2799_v9  ;;  %v2712_v43 = vpack.c.bf16 %v3716_v32, %v3715_v42  ;;  %v2718_v9 = vpack.c.bf16 %v3721_v41, %v3720_v36  ;;  %v2727_v42 = vpack.c.bf16 %v3727_v60, %v3726_v59  ;;  %v1857_v41 = vld [vmem:[#allocation2 + $0x121] ss:$0 sm:$0xff]  ;;  %v2814_v60 = vpack.c.bf16 %v3274_v4, %v3272_v16 }
 0x16b   :  { %2262 = vmatmul.mubr.f32.vlgmr.msra.gmra.mrb[0].mxu1 %v3241_v2  ;;  %2801 = vmatprep.subr.bf16.mxu0 %v2968_v0  ;;  %v3722_v2 = vand.u32 4294901760, %v3069_v63  ;;  %v3728_v63 = vand.u32 4294901760, %v3143_v29 }
 0x16c   :  { %2689 = vmatpush3.bf16.msra.mxu1 %v3030_v28  ;;  %2296 = vmatprep.mubr.msk.f32.mxu1 %vm2969_vm0, %v3714_v55 }
 0x16d   :  { %2690 = vmatprep.subr.bf16.mxu1 %v2968_v0  ;;  %v2721_v58 = vpack.c.bf16 %v3723_v54, %v3722_v2  ;;  %v2730_v32 = vpack.c.bf16 %v3729_v5, %v3728_v63  ;;  %v2817_v63 = vpack.c.bf16 %v3294_v44, %v3283_v45  ;;  %v3738_v5 = vld [vmem:[#allocation5_spill] sm:$0xff] }
 0x16e   :  { %2803 = vmatpush3.bf16.msra.mxu0 %v2802_v46  ;;  %v2724_v46 = vpack.c.bf16 %v3725_v12, %v3724_v56  ;;  %v2811_v12 = vpack.c.bf16 %v3270_v17, %v3266_v23 }
 0x16f   :  { %2804 = vmatprep.subr.bf16.mxu0 %v2968_v0 }
 0x170   :  { %2692 = vmatpush3.bf16.msra.mxu1 %v3056_v53 }
 0x171   :  { %2693 = vmatprep.subr.bf16.mxu1 %v2968_v0 }
 0x174   :  { %2695 = vmatpush3.bf16.msra.mxu1 %v3067_v61 }
 0x175   :  { %2696 = vmatprep.subr.bf16.mxu1 %v2968_v0 }
 0x178   :  { %2698 = vmatpush3.bf16.msra.mxu1 %v3082_v8 }
 0x179   :  { %2699 = vmatprep.subr.bf16.mxu1 %v2968_v0 }
 0x17c   :  { %2701 = vmatpush3.bf16.msra.mxu1 %v3090_v10 }
 0x17d   :  { %2702 = vmatprep.subr.bf16.mxu1 %v2968_v0 }
 0x180   :  { %2704 = vmatpush3.bf16.msra.mxu1 %v3132_v19 }
 0x181   :  { %2705 = vmatprep.subr.bf16.mxu1 %v2968_v0 }
 0x184   :  { %2707 = vmatpush3.bf16.msra.mxu1 %v3136_v22 }
 0x185   :  { %2708 = vmatprep.subr.bf16.mxu1 %v2968_v0 }
 0x188   :  { %2710 = vmatpush3.bf16.msra.mxu1 %v3150_v35 }
 0x189   :  { %2711 = vmatprep.subr.bf16.mxu1 %v2968_v0 }
 0x18b   :  { %2297 = vmatmul.mubr.f32.vlgmr.msra.gmra.mrb[0].mxu1 %v3717_v48 }
 0x18c   :  { %2713 = vmatpush3.bf16.msra.mxu1 %v2712_v43  ;;  %2331 = vmatprep.mubr.msk.f32.mxu1 %vm2969_vm0, %v3714_v55  ;;  %v2733_v43 = vpack.c.bf16 %v3731_v7, %v3730_v6  ;;  %v2823_v6 = vpack.c.bf16 %v3365_v3, %v3358_v57  ;;  %v2826_v7 = vpack.c.bf16 %v3389_v24, %v3384_v51 }
 0x18d   :  { %2714 = vmatprep.subr.bf16.mxu1 %v2968_v0 }
 0x190   :  { %2716 = vmatpush3.bf16.msra.mxu1 %v2715_v50  ;;  %v3539_v50 = vpack.c.bf16 %v3735_v13, %v3734_v34 }
 0x191   :  { %2717 = vmatprep.subr.bf16.mxu1 %v2968_v0 }
 0x194   :  { %2719 = vmatpush3.bf16.msra.mxu1 %v2718_v9 }
 0x195   :  { %2720 = vmatprep.subr.bf16.mxu1 %v2968_v0 }
 0x198   :  { %2722 = vmatpush3.bf16.msra.mxu1 %v2721_v58 }
 0x199   :  { %2723 = vmatprep.subr.bf16.mxu1 %v2968_v0 }
 0x19c   :  { %2725 = vmatpush3.bf16.msra.mxu1 %v2724_v46 }
 0x19d   :  { %2726 = vmatprep.subr.bf16.mxu1 %v2968_v0 }
 0x1a0   :  { %2728 = vmatpush3.bf16.msra.mxu1 %v2727_v42 }
 0x1a1   :  { %2729 = vmatprep.subr.bf16.mxu1 %v2968_v0 }
 0x1a4   :  { %2731 = vmatpush3.bf16.msra.mxu1 %v2730_v32  ;;  %v2820_v32 = vpack.c.bf16 %v3738_v5, %v3335_v52 }
 0x1a5   :  { %2732 = vmatprep.subr.bf16.mxu1 %v2968_v0 }
 0x1a8   :  { %2734 = vmatpush3.bf16.msra.mxu1 %v2733_v43  ;;  %v3739_v43 = vand.u32 4294901760, %v3262_v14  ;;  %v3743_v14 = vand.u32 4294901760, %v3272_v16  ;;  %v3750_v16 = vand.u32 4294901760, %v3365_v3 }
 0x1a9   :  { %2735 = vmatprep.subr.bf16.mxu1 %v2968_v0 }
 0x1ab   :  { %2332 = vmatmul.mubr.f32.vlgmr.msra.gmra.mrb[0].mxu1 %v3238_v15 }
 0x1ac   :  { %2737 = vmatpush3.bf16.msra.mxu1 %v3030_v28  ;;  %2366 = vmatprep.mubr.msk.f32.mxu1 %vm2969_vm0, %v3714_v55  ;;  %v60_v28 = vld [vmem:[#allocation2 + $0x110] sm:$0xff] }
 0x1ad   :  { %2738 = vmatprep.subr.bf16.mxu1 %v2968_v0 }
 0x1b0   :  { %2740 = vmatpush3.bf16.msra.mxu1 %v3056_v53  ;;  %v61_v53 = vld [vmem:[#allocation2 + $0x118] sm:$0xff] }
 0x1b1   :  { %2741 = vmatprep.subr.bf16.mxu1 %v2968_v0 }
 0x1b4   :  { %2743 = vmatpush3.bf16.msra.mxu1 %v3067_v61  ;;  %v1252_v61 = vand.u32 4294901760, %v60_v28 }
 0x1b5   :  { %2744 = vmatprep.subr.bf16.mxu1 %v2968_v0 }
 0x1b8   :  { %2746 = vmatpush3.bf16.msra.mxu1 %v3082_v8  ;;  %v1255_v8 = vand.u32 4294901760, %v61_v53 }
 0x1b9   :  { %2747 = vmatprep.subr.bf16.mxu1 %v2968_v0 }
 0x1ba   :  { %v3552_v1 = vpack.c.bf16 %v1255_v8, %v1252_v61 }
 0x1bc   :  { %2749 = vmatpush3.bf16.msra.mxu1 %v3090_v10  ;;  %v3515_v10 = vsub.f32 %v60_v28, %v1252_v61  ;;  %v3740_v28 = vand.u32 4294901760, %v3264_v25  ;;  %v3741_v61 = vand.u32 4294901760, %v3266_v23  ;;  %v3744_v25 = vand.u32 4294901760, %v3274_v4 }
 0x1bd   :  { %2750 = vmatprep.subr.bf16.mxu1 %v2968_v0  ;;  %v3746_v23 = vand.u32 4294901760, %v3294_v44  ;;  %v3749_v4 = vand.u32 4294901760, %v3358_v57  ;;  %v2874_v44 = vpack.c.bf16 %v1394_v47, %v1387_v11 }
 0x1c0   :  { %2752 = vmatpush3.bf16.msra.mxu1 %v3132_v19  ;;  %v3517_v19 = vsub.f32 %v61_v53, %v1255_v8  ;;  %v2856_v53 = vpack.c.bf16 %v3740_v28, %v3739_v43  ;;  %v3742_v8 = vand.u32 4294901760, %v3270_v17 }
 0x1c1   :  { %2753 = vmatprep.subr.bf16.mxu1 %v2968_v0 }
 0x1c2   :  { %v1408_v26 = vand.u32 4294901760, %v3517_v19  ;;  %v2829_v40 = vpack.c.bf16 %v3517_v19, %v3515_v10 }
 0x1c4   :  { %2755 = vmatpush3.bf16.msra.mxu1 %v3136_v22  ;;  %v1401_v22 = vand.u32 4294901760, %v3515_v10  ;;  %v1409_v29 = vsub.f32 %v3517_v19, %v1408_v26 }
 0x1c5   :  { %2756 = vmatprep.subr.bf16.mxu1 %v2968_v0 }
 0x1c6   :  { %v1402_v27 = vsub.f32 %v3515_v10, %v1401_v22 }
 0x1c8   :  { %2758 = vmatpush3.bf16.msra.mxu1 %v3150_v35  ;;  %v3733_v35 = vand.u32 4294901760, %v3312_v33  ;;  %v1403_v38 = vand.u32 4294901760, %v1402_v27  ;;  %v3736_v33 = vand.u32 4294901760, %v3350_v18  ;;  %v2859_v27 = vpack.c.bf16 %v3742_v8, %v3741_v61 }
 0x1c9   :  { %2759 = vmatprep.subr.bf16.mxu1 %v2968_v0 }
 0x1ca   :  { %v3531_v37 = vpack.c.bf16 %v3733_v35, %v3732_v30  ;;  %v3548_v36 = vpack.c.bf16 %v3737_v62, %v3736_v33  ;;  %v3745_v30 = vand.u32 4294901760, %v3283_v45  ;;  %v3747_v35 = vand.u32 4294901760, %v3335_v52  ;;  %v1858_v52 = vld [vmem:[#allocation2 + $0x122] ss:$0 sm:$0xff] }
 0x1cb   :  { %2367 = vmatmul.mubr.f32.vlgmr.msra.gmra.mrb[0].mxu1 %v3238_v15  ;;  %v1410_v15 = vand.u32 4294901760, %v1409_v29  ;;  %v2862_v29 = vpack.c.bf16 %v3744_v25, %v3743_v14  ;;  %v2877_v45 = vpack.c.bf16 %v1408_v26, %v1401_v22 }
 0x1cc   :  { %2761 = vmatpush3.bf16.msra.mxu1 %v3268_v20  ;;  %2401 = vmatprep.mubr.msk.f32.mxu1 %vm2969_vm0, %v3714_v55  ;;  %v2865_v17 = vpack.c.bf16 %v3746_v23, %v3745_v30 }
 0x1cd   :  { %2762 = vmatprep.subr.bf16.mxu1 %v2968_v0  ;;  %v2805_v48 = vpack.c.bf16 %v1410_v15, %v1403_v38  ;;  %v3748_v38 = vand.u32 4294901760, %v3738_v5 }
 0x1cf   :  { %2806 = vmatpush3.bf16.msra.mxu0 %v2805_v48  ;;  %v2868_v15 = vpack.c.bf16 %v3748_v38, %v3747_v35  ;;  %v2871_v48 = vpack.c.bf16 %v3750_v16, %v3749_v4 }
 0x1d0   :  { %2764 = vmatpush3.bf16.msra.mxu1 %v3317_v49  ;;  %2807 = vmatprep.subr.bf16.mxu0 %v2968_v0 }
 0x1d1   :  { %2765 = vmatprep.subr.bf16.mxu1 %v2968_v0 }
 0x1d4   :  { %2767 = vmatpush3.bf16.msra.mxu1 %v3337_v21 }
 0x1d5   :  { %2768 = vmatprep.subr.bf16.mxu1 %v2968_v0 }
 0x1d8   :  { %2770 = vmatpush3.bf16.msra.mxu1 %v3348_v39 }
 0x1d9   :  { %2771 = vmatprep.subr.bf16.mxu1 %v2968_v0 }
 0x1dc   :  { %2773 = vmatpush3.bf16.msra.mxu1 %v3531_v37 }
 0x1dd   :  { %2774 = vmatprep.subr.bf16.mxu1 %v2968_v0 }
 0x1e0   :  { %2776 = vmatpush3.bf16.msra.mxu1 %v3539_v50 }
 0x1e1   :  { %2777 = vmatprep.subr.bf16.mxu1 %v2968_v0 }
 0x1e4   :  { %2779 = vmatpush3.bf16.msra.mxu1 %v3548_v36 }
 0x1e5   :  { %2780 = vmatprep.subr.bf16.mxu1 %v2968_v0 }
 0x1e8   :  { %2782 = vmatpush3.bf16.msra.mxu1 %v3552_v1 }
 0x29e   :  { %v1200_v9 = vpop.f32.mrb[0].mxu1 }
 0x29f   :  { %v2904_v2 = vadd.f32 %v1857_v41, %v1200_v9  ;;  %v2368_v54 = vpop.f32.mrb[1].mxu1 }
 0x2a1   :  { %v1204_v18 = vmax.f32 %v2904_v2, 0.0 }
 0x2a3   :  { %v3559_v58 = vand.u32 4294901760, %v1204_v18 }
 0x2a5   :  { %v1291_v56 = vsub.f32 %v1204_v18, %v3559_v58  ;;  %2437 = vmatmul.mubr.f32.vlgmr.msra.gmra.mrb[2].mxu0 %v3559_v58 }
 0x2a6   :  { %2809 = vmatpush3.bf16.msra.mxu0 %v2808_v31  ;;  %2471 = vmatprep.mubr.msk.f32.mxu0 %vm2969_vm0, %v3714_v55 }
 0x2a7   :  { %v1292_v46 = vand.u32 4294901760, %v1291_v56  ;;  %2810 = vmatprep.subr.bf16.mxu0 %v2968_v0 }
 0x2a9   :  { %v1293_v59 = vsub.f32 %v1291_v56, %v1292_v46 }
 0x2aa   :  { %2812 = vmatpush3.bf16.msra.mxu0 %v2811_v12 }
 0x2ab   :  { %2813 = vmatprep.subr.bf16.mxu0 %v2968_v0  ;;  %v1294_v42 = vand.u32 4294901760, %v1293_v59 }
 0x2ad   :  { %2402 = vmatmul.mubr.f32.vlgmr.msra.gmra.mrb[2].mxu1 %v1294_v42 }
 0x2ae   :  { %2815 = vmatpush3.bf16.msra.mxu0 %v2814_v60 }
 0x2af   :  { %2816 = vmatprep.subr.bf16.mxu0 %v2968_v0 }
 0x2b2   :  { %2818 = vmatpush3.bf16.msra.mxu0 %v2817_v63 }
 0x2b3   :  { %2819 = vmatprep.subr.bf16.mxu0 %v2968_v0 }
 0x2b6   :  { %2821 = vmatpush3.bf16.msra.mxu0 %v2820_v32 }
 0x2b7   :  { %2822 = vmatprep.subr.bf16.mxu0 %v2968_v0 }
 0x2ba   :  { %2824 = vmatpush3.bf16.msra.mxu0 %v2823_v6 }
 0x2bb   :  { %2825 = vmatprep.subr.bf16.mxu0 %v2968_v0 }
 0x2be   :  { %2827 = vmatpush3.bf16.msra.mxu0 %v2826_v7 }
 0x2bf   :  { %2828 = vmatprep.subr.bf16.mxu0 %v2968_v0 }
 0x2c2   :  { %2830 = vmatpush3.bf16.msra.mxu0 %v2829_v40 }
 0x2c3   :  { %2831 = vmatprep.subr.bf16.mxu0 %v2968_v0 }
 0x2c5   :  { %2472 = vmatmul.mubr.f32.vlgmr.msra.gmra.mrb[2].mxu0 %v1291_v56 }
 0x2c6   :  { %2833 = vmatpush3.bf16.msra.mxu0 %v3268_v20  ;;  %2506 = vmatprep.mubr.msk.f32.mxu0 %vm2969_vm0, %v3714_v55 }
 0x2c7   :  { %2834 = vmatprep.subr.bf16.mxu0 %v2968_v0 }
 0x2ca   :  { %2836 = vmatpush3.bf16.msra.mxu0 %v3317_v49 }
 0x2cb   :  { %2837 = vmatprep.subr.bf16.mxu0 %v2968_v0 }
 0x2ce   :  { %2839 = vmatpush3.bf16.msra.mxu0 %v3337_v21 }
 0x2cf   :  { %2840 = vmatprep.subr.bf16.mxu0 %v2968_v0 }
 0x2d2   :  { %2842 = vmatpush3.bf16.msra.mxu0 %v3348_v39 }
 0x2d3   :  { %2843 = vmatprep.subr.bf16.mxu0 %v2968_v0 }
 0x2d6   :  { %2845 = vmatpush3.bf16.msra.mxu0 %v3531_v37 }
 0x2d7   :  { %2846 = vmatprep.subr.bf16.mxu0 %v2968_v0 }
 0x2da   :  { %2848 = vmatpush3.bf16.msra.mxu0 %v3539_v50 }
 0x2db   :  { %2849 = vmatprep.subr.bf16.mxu0 %v2968_v0 }
 0x2de   :  { %2851 = vmatpush3.bf16.msra.mxu0 %v3548_v36 }
 0x2df   :  { %2852 = vmatprep.subr.bf16.mxu0 %v2968_v0 }
 0x2e2   :  { %2854 = vmatpush3.bf16.msra.mxu0 %v3552_v1 }
 0x2e3   :  { %2855 = vmatprep.subr.bf16.mxu0 %v2968_v0 }
 0x2e5   :  { %2507 = vmatmul.mubr.f32.vlgmr.msra.gmra.mrb[2].mxu0 %v1292_v46 }
 0x2e6   :  { %2857 = vmatpush3.bf16.msra.mxu0 %v2856_v53  ;;  %2541 = vmatprep.mubr.msk.f32.mxu0 %vm2969_vm0, %v3714_v55 }
 0x2e7   :  { %2858 = vmatprep.subr.bf16.mxu0 %v2968_v0 }
 0x2ea   :  { %2860 = vmatpush3.bf16.msra.mxu0 %v2859_v27 }
 0x2eb   :  { %2861 = vmatprep.subr.bf16.mxu0 %v2968_v0 }
 0x2ee   :  { %2863 = vmatpush3.bf16.msra.mxu0 %v2862_v29 }
 0x2ef   :  { %2864 = vmatprep.subr.bf16.mxu0 %v2968_v0 }
 0x2f2   :  { %2866 = vmatpush3.bf16.msra.mxu0 %v2865_v17 }
 0x2f3   :  { %2867 = vmatprep.subr.bf16.mxu0 %v2968_v0 }
 0x2f6   :  { %2869 = vmatpush3.bf16.msra.mxu0 %v2868_v15 }
 0x2f7   :  { %2870 = vmatprep.subr.bf16.mxu0 %v2968_v0 }
 0x2fa   :  { %2872 = vmatpush3.bf16.msra.mxu0 %v2871_v48 }
 0x2fb   :  { %2873 = vmatprep.subr.bf16.mxu0 %v2968_v0 }
 0x2fe   :  { %2875 = vmatpush3.bf16.msra.mxu0 %v2874_v44 }
 0x2ff   :  { %2876 = vmatprep.subr.bf16.mxu0 %v2968_v0 }
 0x302   :  { %2878 = vmatpush3.bf16.msra.mxu0 %v2877_v45 }
 0x303   :  { %2879 = vmatprep.subr.bf16.mxu0 %v2968_v0 }
 0x305   :  { %2542 = vmatmul.mubr.f32.vlgmr.msra.gmra.mrb[2].mxu0 %v3559_v58 }
 0x306   :  { %2881 = vmatpush3.bf16.msra.mxu0 %v3268_v20  ;;  %2576 = vmatprep.mubr.msk.f32.mxu0 %vm2969_vm0, %v3714_v55 }
 0x307   :  { %2882 = vmatprep.subr.bf16.mxu0 %v2968_v0 }
 0x30a   :  { %2884 = vmatpush3.bf16.msra.mxu0 %v3317_v49 }
 0x30b   :  { %2885 = vmatprep.subr.bf16.mxu0 %v2968_v0 }
 0x30e   :  { %2887 = vmatpush3.bf16.msra.mxu0 %v3337_v21 }
 0x30f   :  { %2888 = vmatprep.subr.bf16.mxu0 %v2968_v0 }
 0x312   :  { %2890 = vmatpush3.bf16.msra.mxu0 %v3348_v39 }
 0x313   :  { %2891 = vmatprep.subr.bf16.mxu0 %v2968_v0 }
 0x316   :  { %2893 = vmatpush3.bf16.msra.mxu0 %v3531_v37 }
 0x317   :  { %2894 = vmatprep.subr.bf16.mxu0 %v2968_v0 }
 0x31a   :  { %2896 = vmatpush3.bf16.msra.mxu0 %v3539_v50 }
 0x31b   :  { %2897 = vmatprep.subr.bf16.mxu0 %v2968_v0 }
 0x31e   :  { %2899 = vmatpush3.bf16.msra.mxu0 %v3548_v36 }
 0x31f   :  { %2900 = vmatprep.subr.bf16.mxu0 %v2968_v0 }
 0x322   :  { %2902 = vmatpush3.bf16.msra.mxu0 %v3552_v1 }
 0x325   :  { %2577 = vmatmul.mubr.f32.vlgmr.msra.gmra.mrb[2].mxu0 %v3559_v58 }
 0x380   :  { %v1296_v20 = vpop.f32.mrb[2].mxu1 }
 0x381   :  { %v2403_v49 = vpop.f32.mrb[3].mxu1  ;;  %v1297_v21 = vadd.f32 %v1858_v52, %v1296_v20 }
 0x3f8   :  { %v1846_v11 = vpop.f32.mrb[2].mxu0 }
 0x3f9   :  { %v2906_v39 = vadd.f32 %v1846_v11, %v1297_v21  ;;  %v2578_v57 = vpop.f32.mrb[3].mxu0 }
 0x3fb   :  { %1850 = vst [vmem:[%s3669_s2] sm:$0xff] %v2906_v39 }
 0x3fc   :  { %1855 = vsyncpa [#allocation3], 1 }

</bundles_post_ra>
